<compile_context>
chip_gen: v7x
topology: tpu7x:2x2x1
jax: 0.10.0
libtpu: 0.0.40
codegen_flags: <defaults>
</compile_context>

<pallas_src>
import functools

import jax
import jax.numpy as jnp
from jax.experimental import pallas as pl
from jax.experimental.pallas import tpu as pltpu


def _compressor_kernel(attn_ref, conv_ref, lstm_ref,
                       w1_ref, b1_ref, gamma_ref, beta_ref,
                       w2_ref, b2_ref, out_ref,
                       acc_a_ref, acc_c_ref, acc_l_ref,
                       *, seq_len, d_model):
    s_idx = pl.program_id(1)

    # --- init per-batch-tile sequence-sum accumulators -----------------------
    @pl.when(s_idx == 0)
    def _():
        acc_a_ref[...] = jnp.zeros_like(acc_a_ref)
        acc_c_ref[...] = jnp.zeros_like(acc_c_ref)
        acc_l_ref[...] = jnp.zeros_like(acc_l_ref)

    # --- streaming phase: accumulate sums over the sequence axis (f32) -------
    acc_a_ref[...] += jnp.sum(attn_ref[...].astype(jnp.float32), axis=1)
    acc_c_ref[...] += jnp.sum(conv_ref[...].astype(jnp.float32), axis=1)
    acc_l_ref[...] += jnp.sum(lstm_ref[...].astype(jnp.float32), axis=1)

    # --- finalize: MLP tail on the last sequence step -------------------------
    @pl.when(s_idx == pl.num_programs(1) - 1)
    def _():
        inv_s = jnp.float32(1.0 / seq_len)
        attn_m = acc_a_ref[...] * inv_s            # (TB, D)
        conv_m = acc_c_ref[...] * inv_s
        lstm_m = acc_l_ref[...] * inv_s

        D = d_model
        # concat-free Linear(3D, H1): three MXU accumulates against static
        # row-slices of w1 (no lane-dim concatenate / layout copies).
        h = (jnp.dot(attn_m, w1_ref[:D, :], preferred_element_type=jnp.float32)
             + jnp.dot(conv_m, w1_ref[D:2 * D, :], preferred_element_type=jnp.float32)
             + jnp.dot(lstm_m, w1_ref[2 * D:, :], preferred_element_type=jnp.float32)
             + b1_ref[...])

        # LayerNorm(H1), eps = 1e-5, stats in f32
        mu = jnp.mean(h, axis=-1, keepdims=True)
        var = jnp.mean((h - mu) * (h - mu), axis=-1, keepdims=True)
        hn = (h - mu) * jax.lax.rsqrt(var + 1e-5)
        hn = hn * gamma_ref[...] + beta_ref[...]

        # LeakyReLU (negative_slope = 0.01, PyTorch default)
        hn = jnp.where(hn > 0, hn, 0.01 * hn)

        # Linear(H1, H2)
        out = jnp.dot(hn, w2_ref[...], preferred_element_type=jnp.float32) + b2_ref[...]
        out_ref[...] = out.astype(out_ref.dtype)


def _pick_tile(n, cap, mult):
    """Largest divisor of n that is <= cap and a multiple of `mult`
    (falls back to n itself, i.e. the full/un-tiled dimension)."""
    if n <= cap:
        return n
    for d in range(min(cap, n), 0, -1):
        if n % d == 0 and d % mult == 0:
            return d
    return n


def _pick_tiles(B, S, D, itemsize, budget_bytes=12 * 1024 * 1024):
    # Batch tile: second-to-last dim of the output block -> multiple of 8
    # (or equal to B).  Cap at 128 rows.
    TB = _pick_tile(B, 128, 8)
    # Sequence tile: sized so 3 inputs x 2 pipeline buffers fit well inside
    # the scoped-VMEM default on every generation (v7x has only 64 MiB total).
    bytes_per_seq_elem = 6 * TB * D * itemsize        # 3 inputs x 2 buffers
    ts_cap = max(8, budget_bytes // max(bytes_per_seq_elem, 1))
    TS = _pick_tile(S, int(ts_cap), 8)
    return TB, TS


def compressor_forward(attn_out, conv_out, lstm_out,
                       w1, b1, gamma, beta, w2, b2):
    B, S, D = attn_out.shape
    H2 = w2.shape[1]
    itemsize = jnp.dtype(attn_out.dtype).itemsize
    TB, TS = _pick_tiles(B, S, D, itemsize)
    grid = (B // TB, S // TS)

    seq_spec = lambda: pl.BlockSpec((TB, TS, D), lambda b, s: (b, s, 0))
    # Parameters: full-array blocks with constant index maps -> fetched once.
    const_spec = lambda arr: pl.BlockSpec(arr.shape, lambda b, s: (0, 0))

    kernel = functools.partial(_compressor_kernel, seq_len=S, d_model=D)

    return pl.pallas_call(
        kernel,
        out_shape=jax.ShapeDtypeStruct((B, H2), jnp.float32),
        grid_spec=pltpu.PrefetchScalarGridSpec(
            num_scalar_prefetch=0,
            grid=grid,
            in_specs=[
                seq_spec(), seq_spec(), seq_spec(),
                const_spec(w1), const_spec(b1),
                const_spec(gamma), const_spec(beta),
                const_spec(w2), const_spec(b2),
            ],
            out_specs=pl.BlockSpec((TB, H2), lambda b, s: (b, 0)),
            scratch_shapes=[
                pltpu.VMEM((TB, D), jnp.float32),   # attn sum accumulator
                pltpu.VMEM((TB, D), jnp.float32),   # conv sum accumulator
                pltpu.VMEM((TB, D), jnp.float32),   # lstm sum accumulator
            ],
        ),
        compiler_params=pltpu.CompilerParams(
            # batch axis -> parallel (v7x two TensorCores); seq reduction last,
            # arbitrary (output block + scratch carried across it).
            dimension_semantics=("parallel", "arbitrary"),
        ),
    )(attn_out, conv_out, lstm_out, w1, b1, gamma, beta, w2, b2)


def _reference(attn_out, conv_out, lstm_out, w1, b1, gamma, beta, w2, b2):
    x = jnp.concatenate(
        [attn_out.mean(1), conv_out.mean(1), lstm_out.mean(1)], axis=1)
    h = x @ w1 + b1
    mu = h.mean(-1, keepdims=True)
    var = ((h - mu) ** 2).mean(-1, keepdims=True)
    hn = (h - mu) / jnp.sqrt(var + 1e-5) * gamma + beta
    hn = jnp.where(hn > 0, hn, 0.01 * hn)
    return hn @ w2 + b2


if __name__ == "__main__":
    # small shapes consistent with the module
    B, S, D = 2, 8, 32          # batch, seq, d_model
    H1, H2 = 64, 16             # shape_1, shape_2

    key = jax.random.PRNGKey(0)
    ks = jax.random.split(key, 9)

    attn_out = jax.random.normal(ks[0], (B, S, D), jnp.float32)
    conv_out = jax.random.normal(ks[1], (B, S, D), jnp.float32)
    lstm_out = jax.random.normal(ks[2], (B, S, D), jnp.float32)

    # PyTorch shapes: Linear(3D->H1), LN(H1), Linear(H1->H2);
    # weights stored transposed relative to nn.Linear.weight.
    w1 = jax.random.normal(ks[3], (3 * D, H1), jnp.float32) * (1.0 / jnp.sqrt(3.0 * D))
    b1 = jax.random.normal(ks[4], (1, H1), jnp.float32) * 0.01
    gamma = jnp.ones((1, H1), jnp.float32)
    beta = jnp.zeros((1, H1), jnp.float32)
    w2 = jax.random.normal(ks[5], (H1, H2), jnp.float32) * (1.0 / jnp.sqrt(H1))
    b2 = jax.random.normal(ks[6], (1, H2), jnp.float32) * 0.01

    out = compressor_forward(attn_out, conv_out, lstm_out,
                             w1, b1, gamma, beta, w2, b2)
    out = jax.block_until_ready(out)

    ref = _reference(attn_out, conv_out, lstm_out, w1, b1, gamma, beta, w2, b2)
    assert out.shape == (B, H2)
    assert jnp.allclose(out, ref, atol=1e-4, rtol=1e-4)

    print("KERNEL_OK")
</pallas_src>

<mosaic_0001>
module attributes {stable_mosaic.version = 11 : i64} {
  func.func @_compressor_kernel(%arg0: i32, %arg1: i32, %arg2: memref<2x8x32xf32, #tpu.memory_space<vmem>>, %arg3: memref<2x8x32xf32, #tpu.memory_space<vmem>>, %arg4: memref<2x8x32xf32, #tpu.memory_space<vmem>>, %arg5: memref<96x64xf32, #tpu.memory_space<vmem>>, %arg6: memref<1x64xf32, #tpu.memory_space<vmem>>, %arg7: memref<1x64xf32, #tpu.memory_space<vmem>>, %arg8: memref<1x64xf32, #tpu.memory_space<vmem>>, %arg9: memref<64x16xf32, #tpu.memory_space<vmem>>, %arg10: memref<1x16xf32, #tpu.memory_space<vmem>>, %arg11: memref<2x16xf32, #tpu.memory_space<vmem>>, %arg12: memref<2x32xf32, #tpu.memory_space<vmem>>, %arg13: memref<2x32xf32, #tpu.memory_space<vmem>>, %arg14: memref<2x32xf32, #tpu.memory_space<vmem>>) attributes {dimension_semantics = [#tpu.dimension_semantics<parallel>, #tpu.dimension_semantics<arbitrary>], iteration_bounds = array<i64: 1, 1>, scalar_prefetch = 0 : i64, scratch_operands = 3 : i64, tpu.core_type = #tpu.core_type<tc>, window_params = [{transform_indices = @transform_0, window_bounds = array<i64: 2, 8, 32>}, {transform_indices = @transform_1, window_bounds = array<i64: 2, 8, 32>}, {transform_indices = @transform_2, window_bounds = array<i64: 2, 8, 32>}, {pipeline_mode = #tpu.pipeline_mode<synchronous>, transform_indices = @transform_3, window_bounds = array<i64: 96, 64>}, {pipeline_mode = #tpu.pipeline_mode<synchronous>, transform_indices = @transform_4, window_bounds = array<i64: 1, 64>}, {pipeline_mode = #tpu.pipeline_mode<synchronous>, transform_indices = @transform_5, window_bounds = array<i64: 1, 64>}, {pipeline_mode = #tpu.pipeline_mode<synchronous>, transform_indices = @transform_6, window_bounds = array<i64: 1, 64>}, {pipeline_mode = #tpu.pipeline_mode<synchronous>, transform_indices = @transform_7, window_bounds = array<i64: 64, 16>}, {pipeline_mode = #tpu.pipeline_mode<synchronous>, transform_indices = @transform_8, window_bounds = array<i64: 1, 16>}, {transform_indices = @transform_9, window_bounds = array<i64: 2, 16>}]} {
    %c0_i32 = arith.constant 0 : i32
    %0 = arith.cmpi eq, %arg1, %c0_i32 : i32
    %1 = arith.extui %0 : i1 to i32
    %c0_i32_0 = arith.constant 0 : i32
    %2 = arith.cmpi ne, %1, %c0_i32_0 : i32
    scf.if %2 {
      %cst_25 = arith.constant 0.000000e+00 : f32
      %21 = vector.broadcast %cst_25 : f32 to vector<2x32xf32>
      %c0_26 = arith.constant 0 : index
      %c0_27 = arith.constant 0 : index
      %22 = vector.load %arg12[%c0_26, %c0_27] : memref<2x32xf32, #tpu.memory_space<vmem>>, vector<2x32xf32>
      tpu.vector_store %arg12[%c0_26, %c0_27], %21 {strides = array<i32>} : memref<2x32xf32, #tpu.memory_space<vmem>>, vector<2x32xf32>,
      %cst_28 = arith.constant 0.000000e+00 : f32
      %23 = vector.broadcast %cst_28 : f32 to vector<2x32xf32>
      %c0_29 = arith.constant 0 : index
      %c0_30 = arith.constant 0 : index
      %24 = vector.load %arg13[%c0_29, %c0_30] : memref<2x32xf32, #tpu.memory_space<vmem>>, vector<2x32xf32>
      tpu.vector_store %arg13[%c0_29, %c0_30], %23 {strides = array<i32>} : memref<2x32xf32, #tpu.memory_space<vmem>>, vector<2x32xf32>,
      %cst_31 = arith.constant 0.000000e+00 : f32
      %25 = vector.broadcast %cst_31 : f32 to vector<2x32xf32>
      %c0_32 = arith.constant 0 : index
      %c0_33 = arith.constant 0 : index
      %26 = vector.load %arg14[%c0_32, %c0_33] : memref<2x32xf32, #tpu.memory_space<vmem>>, vector<2x32xf32>
      tpu.vector_store %arg14[%c0_32, %c0_33], %25 {strides = array<i32>} : memref<2x32xf32, #tpu.memory_space<vmem>>, vector<2x32xf32>,
    } else {
    }
    %c0 = arith.constant 0 : index
    %c0_1 = arith.constant 0 : index
    %3 = vector.load %arg12[%c0, %c0_1] : memref<2x32xf32, #tpu.memory_space<vmem>>, vector<2x32xf32>
    %c0_2 = arith.constant 0 : index
    %c0_3 = arith.constant 0 : index
    %c0_4 = arith.constant 0 : index
    %4 = vector.load %arg2[%c0_2, %c0_3, %c0_4] : memref<2x8x32xf32, #tpu.memory_space<vmem>>, vector<2x8x32xf32>
    %cst = arith.constant dense<0.000000e+00> : vector<2x32xf32>
    %5 = vector.multi_reduction <add>, %4, %cst [1] : vector<2x8x32xf32> to vector<2x32xf32>
    %6 = arith.addf %3, %5 : vector<2x32xf32>
    %c0_5 = arith.constant 0 : index
    %c0_6 = arith.constant 0 : index
    %7 = vector.load %arg12[%c0_5, %c0_6] : memref<2x32xf32, #tpu.memory_space<vmem>>, vector<2x32xf32>
    tpu.vector_store %arg12[%c0_5, %c0_6], %6 {strides = array<i32>} : memref<2x32xf32, #tpu.memory_space<vmem>>, vector<2x32xf32>,
    %c0_7 = arith.constant 0 : index
    %c0_8 = arith.constant 0 : index
    %8 = vector.load %arg13[%c0_7, %c0_8] : memref<2x32xf32, #tpu.memory_space<vmem>>, vector<2x32xf32>
    %c0_9 = arith.constant 0 : index
    %c0_10 = arith.constant 0 : index
    %c0_11 = arith.constant 0 : index
    %9 = vector.load %arg3[%c0_9, %c0_10, %c0_11] : memref<2x8x32xf32, #tpu.memory_space<vmem>>, vector<2x8x32xf32>
    %cst_12 = arith.constant dense<0.000000e+00> : vector<2x32xf32>
    %10 = vector.multi_reduction <add>, %9, %cst_12 [1] : vector<2x8x32xf32> to vector<2x32xf32>
    %11 = arith.addf %8, %10 : vector<2x32xf32>
    %c0_13 = arith.constant 0 : index
    %c0_14 = arith.constant 0 : index
    %12 = vector.load %arg13[%c0_13, %c0_14] : memref<2x32xf32, #tpu.memory_space<vmem>>, vector<2x32xf32>
    tpu.vector_store %arg13[%c0_13, %c0_14], %11 {strides = array<i32>} : memref<2x32xf32, #tpu.memory_space<vmem>>, vector<2x32xf32>,
    %c0_15 = arith.constant 0 : index
    %c0_16 = arith.constant 0 : index
    %13 = vector.load %arg14[%c0_15, %c0_16] : memref<2x32xf32, #tpu.memory_space<vmem>>, vector<2x32xf32>
    %c0_17 = arith.constant 0 : index
    %c0_18 = arith.constant 0 : index
    %c0_19 = arith.constant 0 : index
    %14 = vector.load %arg4[%c0_17, %c0_18, %c0_19] : memref<2x8x32xf32, #tpu.memory_space<vmem>>, vector<2x8x32xf32>
    %cst_20 = arith.constant dense<0.000000e+00> : vector<2x32xf32>
    %15 = vector.multi_reduction <add>, %14, %cst_20 [1] : vector<2x8x32xf32> to vector<2x32xf32>
    %16 = arith.addf %13, %15 : vector<2x32xf32>
    %c0_21 = arith.constant 0 : index
    %c0_22 = arith.constant 0 : index
    %17 = vector.load %arg14[%c0_21, %c0_22] : memref<2x32xf32, #tpu.memory_space<vmem>>, vector<2x32xf32>
    tpu.vector_store %arg14[%c0_21, %c0_22], %16 {strides = array<i32>} : memref<2x32xf32, #tpu.memory_space<vmem>>, vector<2x32xf32>,
    %c0_i32_23 = arith.constant 0 : i32
    %18 = arith.cmpi eq, %arg1, %c0_i32_23 : i32
    %19 = arith.extui %18 : i1 to i32
    %c0_i32_24 = arith.constant 0 : i32
    %20 = arith.cmpi ne, %19, %c0_i32_24 : i32
    scf.if %20 {
      %c0_25 = arith.constant 0 : index
      %c0_26 = arith.constant 0 : index
      %21 = vector.load %arg12[%c0_25, %c0_26] : memref<2x32xf32, #tpu.memory_space<vmem>>, vector<2x32xf32>
      %cst_27 = arith.constant 1.250000e-01 : f32
      %22 = vector.broadcast %cst_27 : f32 to vector<2x32xf32>
      %23 = arith.mulf %21, %22 : vector<2x32xf32>
      %c0_28 = arith.constant 0 : index
      %c0_29 = arith.constant 0 : index
      %24 = vector.load %arg13[%c0_28, %c0_29] : memref<2x32xf32, #tpu.memory_space<vmem>>, vector<2x32xf32>
      %cst_30 = arith.constant 1.250000e-01 : f32
      %25 = vector.broadcast %cst_30 : f32 to vector<2x32xf32>
      %26 = arith.mulf %24, %25 : vector<2x32xf32>
      %c0_31 = arith.constant 0 : index
      %c0_32 = arith.constant 0 : index
      %27 = vector.load %arg14[%c0_31, %c0_32] : memref<2x32xf32, #tpu.memory_space<vmem>>, vector<2x32xf32>
      %cst_33 = arith.constant 1.250000e-01 : f32
      %28 = vector.broadcast %cst_33 : f32 to vector<2x32xf32>
      %29 = arith.mulf %27, %28 : vector<2x32xf32>
      %c0_34 = arith.constant 0 : index
      %c0_35 = arith.constant 0 : index
      %30 = vector.load %arg5[%c0_34, %c0_35] : memref<96x64xf32, #tpu.memory_space<vmem>>, vector<32x64xf32>
      %cst_36 = arith.constant dense<0.000000e+00> : vector<2x64xf32>
      %31 = tpu.matmul %23, %30, %cst_36 {dimension_numbers = #tpu.dot_dimension_numbers<[1], [0], [0], [1], [0, 0, 1, 1], [], []>} : vector<2x32xf32>, vector<32x64xf32>, vector<2x64xf32> -> vector<2x64xf32>
      %c32 = arith.constant 32 : index
      %c0_37 = arith.constant 0 : index
      %32 = vector.load %arg5[%c32, %c0_37] : memref<96x64xf32, #tpu.memory_space<vmem>>, vector<32x64xf32>
      %cst_38 = arith.constant dense<0.000000e+00> : vector<2x64xf32>
      %33 = tpu.matmul %26, %32, %cst_38 {dimension_numbers = #tpu.dot_dimension_numbers<[1], [0], [0], [1], [0, 0, 1, 1], [], []>} : vector<2x32xf32>, vector<32x64xf32>, vector<2x64xf32> -> vector<2x64xf32>
      %34 = arith.addf %31, %33 : vector<2x64xf32>
      %c64 = arith.constant 64 : index
      %c0_39 = arith.constant 0 : index
      %35 = vector.load %arg5[%c64, %c0_39] : memref<96x64xf32, #tpu.memory_space<vmem>>, vector<32x64xf32>
      %cst_40 = arith.constant dense<0.000000e+00> : vector<2x64xf32>
      %36 = tpu.matmul %29, %35, %cst_40 {dimension_numbers = #tpu.dot_dimension_numbers<[1], [0], [0], [1], [0, 0, 1, 1], [], []>} : vector<2x32xf32>, vector<32x64xf32>, vector<2x64xf32> -> vector<2x64xf32>
      %37 = arith.addf %34, %36 : vector<2x64xf32>
      %c0_41 = arith.constant 0 : index
      %c0_42 = arith.constant 0 : index
      %38 = vector.load %arg6[%c0_41, %c0_42] : memref<1x64xf32, #tpu.memory_space<vmem>>, vector<1x64xf32>
      %39 = vector.broadcast %38 : vector<1x64xf32> to vector<2x64xf32>
      %40 = arith.addf %37, %39 : vector<2x64xf32>
      %cst_43 = arith.constant dense<0.000000e+00> : vector<2xf32>
      %41 = vector.multi_reduction <add>, %40, %cst_43 [1] : vector<2x64xf32> to vector<2xf32>
      %42 = vector.shape_cast %41 : vector<2xf32> to vector<2x1xf32>
      %cst_44 = arith.constant 6.400000e+01 : f32
      %43 = vector.broadcast %cst_44 : f32 to vector<2x1xf32>
      %44 = arith.divf %42, %43 : vector<2x1xf32>
      %45 = vector.broadcast %44 : vector<2x1xf32> to vector<2x64xf32>
      %46 = arith.subf %40, %45 : vector<2x64xf32>
      %47 = vector.broadcast %44 : vector<2x1xf32> to vector<2x64xf32>
      %48 = arith.subf %40, %47 : vector<2x64xf32>
      %49 = arith.mulf %46, %48 : vector<2x64xf32>
      %cst_45 = arith.constant dense<0.000000e+00> : vector<2xf32>
      %50 = vector.multi_reduction <add>, %49, %cst_45 [1] : vector<2x64xf32> to vector<2xf32>
      %51 = vector.shape_cast %50 : vector<2xf32> to vector<2x1xf32>
      %cst_46 = arith.constant 6.400000e+01 : f32
      %52 = vector.broadcast %cst_46 : f32 to vector<2x1xf32>
      %53 = arith.divf %51, %52 : vector<2x1xf32>
      %54 = vector.broadcast %44 : vector<2x1xf32> to vector<2x64xf32>
      %55 = arith.subf %40, %54 : vector<2x64xf32>
      %cst_47 = arith.constant 9.99999974E-6 : f32
      %56 = vector.broadcast %cst_47 : f32 to vector<2x1xf32>
      %57 = arith.addf %53, %56 : vector<2x1xf32>
      %58 = math.rsqrt %57 : vector<2x1xf32>
      %59 = vector.broadcast %58 : vector<2x1xf32> to vector<2x64xf32>
      %60 = arith.mulf %55, %59 : vector<2x64xf32>
      %c0_48 = arith.constant 0 : index
      %c0_49 = arith.constant 0 : index
      %61 = vector.load %arg7[%c0_48, %c0_49] : memref<1x64xf32, #tpu.memory_space<vmem>>, vector<1x64xf32>
      %62 = vector.broadcast %61 : vector<1x64xf32> to vector<2x64xf32>
      %63 = arith.mulf %60, %62 : vector<2x64xf32>
      %c0_50 = arith.constant 0 : index
      %c0_51 = arith.constant 0 : index
      %64 = vector.load %arg8[%c0_50, %c0_51] : memref<1x64xf32, #tpu.memory_space<vmem>>, vector<1x64xf32>
      %65 = vector.broadcast %64 : vector<1x64xf32> to vector<2x64xf32>
      %66 = arith.addf %63, %65 : vector<2x64xf32>
      %cst_52 = arith.constant 0.000000e+00 : f32
      %67 = vector.broadcast %cst_52 : f32 to vector<2x64xf32>
      %68 = arith.cmpf ogt, %66, %67 : vector<2x64xf32>
      %cst_53 = arith.constant 0.00999999977 : f32
      %69 = vector.broadcast %cst_53 : f32 to vector<2x64xf32>
      %70 = arith.mulf %69, %66 : vector<2x64xf32>
      %71 = arith.select %68, %66, %70 : vector<2x64xi1>, vector<2x64xf32>
      %c0_54 = arith.constant 0 : index
      %c0_55 = arith.constant 0 : index
      %72 = vector.load %arg9[%c0_54, %c0_55] : memref<64x16xf32, #tpu.memory_space<vmem>>, vector<64x16xf32>
      %cst_56 = arith.constant dense<0.000000e+00> : vector<2x16xf32>
      %73 = tpu.matmul %71, %72, %cst_56 {dimension_numbers = #tpu.dot_dimension_numbers<[1], [0], [0], [1], [0, 0, 1, 1], [], []>} : vector<2x64xf32>, vector<64x16xf32>, vector<2x16xf32> -> vector<2x16xf32>
      %c0_57 = arith.constant 0 : index
      %c0_58 = arith.constant 0 : index
      %74 = vector.load %arg10[%c0_57, %c0_58] : memref<1x16xf32, #tpu.memory_space<vmem>>, vector<1x16xf32>
      %75 = vector.broadcast %74 : vector<1x16xf32> to vector<2x16xf32>
      %76 = arith.addf %73, %75 : vector<2x16xf32>
      %c0_59 = arith.constant 0 : index
      %c0_60 = arith.constant 0 : index
      %77 = vector.load %arg11[%c0_59, %c0_60] : memref<2x16xf32, #tpu.memory_space<vmem>>, vector<2x16xf32>
      tpu.vector_store %arg11[%c0_59, %c0_60], %76 {strides = array<i32>} : memref<2x16xf32, #tpu.memory_space<vmem>>, vector<2x16xf32>,
    } else {
    }
    return
  }
  func.func @transform_0(%arg0: i32, %arg1: i32) -> (i32, i32, i32) {
    %c0_i32 = arith.constant 0 : i32
    %c0_i32_0 = arith.constant 0 : i32
    return %arg0, %arg1, %c0_i32 : i32, i32, i32
  }
  func.func @transform_1(%arg0: i32, %arg1: i32) -> (i32, i32, i32) {
    %c0_i32 = arith.constant 0 : i32
    %c0_i32_0 = arith.constant 0 : i32
    return %arg0, %arg1, %c0_i32 : i32, i32, i32
  }
  func.func @transform_2(%arg0: i32, %arg1: i32) -> (i32, i32, i32) {
    %c0_i32 = arith.constant 0 : i32
    %c0_i32_0 = arith.constant 0 : i32
    return %arg0, %arg1, %c0_i32 : i32, i32, i32
  }
  func.func @transform_3(%arg0: i32, %arg1: i32) -> (i32, i32) {
    %c0_i32 = arith.constant 0 : i32
    %c0_i32_0 = arith.constant 0 : i32
    %c0_i32_1 = arith.constant 0 : i32
    return %c0_i32, %c0_i32_0 : i32, i32
  }
  func.func @transform_4(%arg0: i32, %arg1: i32) -> (i32, i32) {
    %c0_i32 = arith.constant 0 : i32
    %c0_i32_0 = arith.constant 0 : i32
    %c0_i32_1 = arith.constant 0 : i32
    return %c0_i32, %c0_i32_0 : i32, i32
  }
  func.func @transform_5(%arg0: i32, %arg1: i32) -> (i32, i32) {
    %c0_i32 = arith.constant 0 : i32
    %c0_i32_0 = arith.constant 0 : i32
    %c0_i32_1 = arith.constant 0 : i32
    return %c0_i32, %c0_i32_0 : i32, i32
  }
  func.func @transform_6(%arg0: i32, %arg1: i32) -> (i32, i32) {
    %c0_i32 = arith.constant 0 : i32
    %c0_i32_0 = arith.constant 0 : i32
    %c0_i32_1 = arith.constant 0 : i32
    return %c0_i32, %c0_i32_0 : i32, i32
  }
  func.func @transform_7(%arg0: i32, %arg1: i32) -> (i32, i32) {
    %c0_i32 = arith.constant 0 : i32
    %c0_i32_0 = arith.constant 0 : i32
    %c0_i32_1 = arith.constant 0 : i32
    return %c0_i32, %c0_i32_0 : i32, i32
  }
  func.func @transform_8(%arg0: i32, %arg1: i32) -> (i32, i32) {
    %c0_i32 = arith.constant 0 : i32
    %c0_i32_0 = arith.constant 0 : i32
    %c0_i32_1 = arith.constant 0 : i32
    return %c0_i32, %c0_i32_0 : i32, i32
  }
  func.func @transform_9(%arg0: i32, %arg1: i32) -> (i32, i32) {
    %c0_i32 = arith.constant 0 : i32
    %c0_i32_0 = arith.constant 0 : i32
    return %arg0, %c0_i32 : i32, i32
  }
}

</mosaic_0001>

<bundles_post_ra>
// kernel: tpu_custom_call.1
= control target key start
LH: loop header
LB: loop body
LE: loop exit
PB: predicated region body
PF: predicated region fallthrough
CT: control target
= control target key end

     0   :  { %vm37_vm0 = vcmask 254976   ;;  %v645_v3 = vmov 0.0|0.0   ;;  %v646_v8 = vmov 0.0   ;;  %vm44_vm1 = vcmask 261120   ;;  %s837_s0 = inlined_call_operand.vmem [shape: f32[2,8,32], index: 0, kind: input, shape index: {}]   ;;  %s838_s1 = inlined_call_operand.vmem [shape: f32[2,8,32], index: 1, kind: input, shape index: {}]   ;;  %s839_s2 = inlined_call_operand.vmem [shape: f32[2,8,32], index: 2, kind: input, shape index: {}]   ;;  %s840_s3 = inlined_call_operand.vmem [shape: f32[96,64], index: 3, kind: input, shape index: {}]   ;;  %s841_s4 = inlined_call_operand.vmem [shape: f32[1,64], index: 4, kind: input, shape index: {}]   ;;  %s842_s5 = inlined_call_operand.vmem [shape: f32[1,64], index: 5, kind: input, shape index: {}]   ;;  %s843_s6 = inlined_call_operand.vmem [shape: f32[1,64], index: 6, kind: input, shape index: {}]   ;;  %s844_s7 = inlined_call_operand.vmem [shape: f32[64,16], index: 7, kind: input, shape index: {}]   ;;  %s845_s8 = inlined_call_operand.vmem [shape: f32[1,16], index: 8, kind: input, shape index: {}]   ;;  %s846_s9 = inlined_call_operand.hbm [shape: f32[2,16], index: 9, kind: output, shape index: {}]  }
   0x1   :  { %v126_v0 = vld [vmem:[%s840_s3 + $0x20] sm:$0xff]  ;;  %v127_v1 = vld [vmem:[%s840_s3 + $0x28] sm:$0xff]  ;;  %585 = vmatprep.subr.bf16.mxu0 %v645_v3  ;;  %591 = vmatprep.subr.bf16.mxu1 %v645_v3  ;;  %v128_v6 = vld [vmem:[%s840_s3 + $0x30] sm:$0xff]  ;;  %38 = vst.msk [vmem:[#allocation2] sm:$0x3] %vm37_vm0, %v646_v8  ;;  %vm647_vm2 = vmmov 0  }
   0x2   :  { %v122_v2 = vld [vmem:[%s840_s3] sm:$0xff]  ;;  %v586_v4 = vpack.c.bf16 %v127_v1, %v126_v0  ;;  %v123_v5 = vld [vmem:[%s840_s3 + $0x8] sm:$0xff]  ;;  %v129_v7 = vld [vmem:[%s840_s3 + $0x38] sm:$0xff]  ;;  %39 = vst.msk [vmem:[#allocation3] sm:$0x3] %vm37_vm0, %v646_v8  ;;  %541 = vmatprep.mubr.msk.f32.mxu0 %vm647_vm2, %v646_v8  ;;  %552 = vmatprep.mubr.msk.f32.mxu1 %vm647_vm2, %v646_v8 }
   0x3   :  { %40 = vst.msk [vmem:[#allocation4] sm:$0x3] %vm37_vm0, %v646_v8  ;;  %v592_v9 = vpack.c.bf16 %v123_v5, %v122_v2  ;;  %v124_v10 = vld [vmem:[%s840_s3 + $0x10] sm:$0xff]  ;;  %v125_v11 = vld [vmem:[%s840_s3 + $0x18] sm:$0xff]  ;;  %v42_v12 = vld [vmem:[%s837_s0] sm:$0xff]  ;;  %v589_v13 = vpack.c.bf16 %v129_v7, %v128_v6 }
   0x4   :  { %587 = vmatpush3.bf16.msra.mxu0 %v586_v4  ;;  %v595_v14 = vpack.c.bf16 %v125_v11, %v124_v10  ;;  %v43_v15 = vld [vmem:[%s837_s0 + $0x8] sm:$0xff]  ;;  %v45_v16 = vsel %vm44_vm1, %v42_v12, 0.0  ;;  %v68_v17 = vld [vmem:[%s838_s1] sm:$0xff] }
   0x5   :  { %v69_v18 = vld [vmem:[%s838_s1 + $0x8] sm:$0xff]  ;;  %593 = vmatpush3.bf16.msra.mxu1 %v592_v9  ;;  %588 = vmatprep.subr.bf16.mxu0 %v645_v3  ;;  %v46_v19 = vrot.slane %v45_v16, 4  ;;  %v52_v20 = vsel %vm44_vm1, %v43_v15, 0.0  ;;  %v70_v21 = vsel %vm44_vm1, %v68_v17, 0.0  ;;  %v91_v23 = vld [vmem:[%s839_s2] sm:$0xff] }
   0x6   :  { %v77_v22 = vsel %vm44_vm1, %v69_v18, 0.0  ;;  %v92_v24 = vld [vmem:[%s839_s2 + $0x8] sm:$0xff]  ;;  %594 = vmatprep.subr.bf16.mxu1 %v645_v3  ;;  %v53_v25 = vrot.slane %v52_v20, 4  ;;  %v71_v26 = vrot.slane %v70_v21, 4  ;;  %v93_v28 = vsel %vm44_vm1, %v91_v23, 0.0 }
   0x7   :  { %v78_v27 = vrot.slane %v77_v22, 4  ;;  %v47_v29 = vadd.f32 %v46_v19, %v45_v16  ;;  %v94_v30 = vrot.slane %v93_v28, 4  ;;  %v100_v31 = vsel %vm44_vm1, %v92_v24, 0.0 }
   0x8   :  { %14 = vsyncpa [#allocation6], 0  ;;  %590 = vmatpush3.bf16.msra.mxu0 %v589_v13  ;;  %v54_v32 = vadd.f32 %v53_v25, %v52_v20  ;;  %v72_v33 = vadd.f32 %v71_v26, %v70_v21  ;;  %v101_v35 = vrot.slane %v100_v31, 4  ;;  %vm61_vm3 = vcmask 1041409   ;;  %v41_v61 = vld [vmem:[#allocation2] sm:$0x3] }
   0x9   :  { %v79_v34 = vadd.f32 %v78_v27, %v77_v22  ;;  %596 = vmatpush3.bf16.msra.mxu1 %v595_v14  ;;  %597 = vmatprep.subr.bf16.mxu0 %v645_v3  ;;  %v48_v36 = vrot.slane %v47_v29, 2  ;;  %v95_v37 = vadd.f32 %v94_v30, %v93_v28  ;;  %v67_v57 = vld [vmem:[#allocation3] sm:$0x3]  ;;  %v277_v10 = vld [vmem:[%s840_s3 + $0x48] sm:$0xff]  ;;  %v278_v16 = vld [vmem:[%s840_s3 + $0x50] sm:$0xff]  ;;  %vm362_vm4 = vcmask 517120  }
   0xa   :  { %v55_v38 = vrot.slane %v54_v32, 2  ;;  %v73_v39 = vrot.slane %v72_v33, 2  ;;  %v102_v41 = vadd.f32 %v101_v35, %v100_v31  ;;  %603 = vmatprep.subr.bf16.mxu1 %v645_v3  ;;  %v90_v2 = vld [vmem:[#allocation4] sm:$0x3]  ;;  %v279_v17 = vld [vmem:[%s840_s3 + $0x58] sm:$0xff]  ;;  %vm411_vm6 = vcmask 523264  }
   0xb   :  { %v80_v40 = vrot.slane %v79_v34, 2  ;;  %v49_v42 = vadd.f32 %v48_v36, %v47_v29  ;;  %v96_v43 = vrot.slane %v95_v37, 2  ;;  %v276_v9 = vld [vmem:[%s840_s3 + $0x40] sm:$0xff]  ;;  %v601_v18 = vpack.c.bf16 %v279_v17, %v278_v16  ;;  %s648_s18 = smov [#allocation5]  }
   0xc   :  { %v56_v44 = vadd.f32 %v55_v38, %v54_v32  ;;  %v74_v45 = vadd.f32 %v73_v39, %v72_v33  ;;  %v103_v47 = vrot.slane %v102_v41, 2  ;;  %v598_v13 = vpack.c.bf16 %v277_v10, %v276_v9  ;;  %v504_v27 = vld [vmem:[%s841_s4] ss:$0 sm:$0xff]  ;;  %v398_v39 = vld [vmem:[%s844_s7 + $0x10] sm:$0xff]  ;;  %s493_s19 = sshll.u32 %s648_s18, 4  ;;  %s494_s19 = int_to_ptr.vmem [resolvable:$true] %s493_s19 }
   0xd   :  { %v81_v46 = vadd.f32 %v80_v40, %v79_v34  ;;  %v50_v48 = vrot.slane %v49_v42, 1  ;;  %v97_v49 = vadd.f32 %v96_v43, %v95_v37  ;;  %v396_v36 = vld [vmem:[%s844_s7] sm:$0xff]  ;;  %v397_v37 = vld [vmem:[%s844_s7 + $0x8] sm:$0xff]  ;;  %v399_v40 = vld [vmem:[%s844_s7 + $0x18] sm:$0xff]  ;;  %vm485_vm7 = vcmask 123904   ;;  %p626_p1 = scmp.lt.s32.totalorder %s494_s19, %s494_s19 }
   0xe   :  { %v57_v50 = vrot.slane %v56_v44, 1  ;;  %v75_v51 = vrot.slane %v74_v45, 1  ;;  %v104_v53 = vadd.f32 %v103_v47, %v102_v41  ;;  %v604_v38 = vpack.c.bf16 %v397_v37, %v396_v36  ;;  %v401_v43 = vld [vmem:[%s844_s7 + $0x28] sm:$0xff] }
   0xf   :  { %v82_v52 = vrot.slane %v81_v46, 1  ;;  %v51_v54 = vadd.f32 %v50_v48, %v49_v42  ;;  %v98_v55 = vrot.slane %v97_v49, 1  ;;  %v607_v41 = vpack.c.bf16 %v399_v40, %v398_v39  ;;  %v400_v42 = vld [vmem:[%s844_s7 + $0x20] sm:$0xff] }
  0x10   :  { %v58_v56 = vadd.f32 %v57_v50, %v56_v44  ;;  %v76_v58 = vadd.f32 %v75_v51, %v74_v45  ;;  %v105_v60 = vrot.slane %v104_v53, 1  ;;  %v610_v44 = vpack.c.bf16 %v401_v43, %v400_v42  ;;  %v402_v45 = vld [vmem:[%s844_s7 + $0x30] sm:$0xff] }
  0x11   :  { %v83_v59 = vadd.f32 %v82_v52, %v81_v46  ;;  %v99_v62 = vadd.f32 %v98_v55, %v97_v49  ;;  %v403_v46 = vld [vmem:[%s844_s7 + $0x38] sm:$0xff]  ;;  %v505_v52 = vld [vmem:[%s842_s5] ss:$0 sm:$0xff]  ;;  %s621_s5 = scalar_lea.vmem %s494_s19, 32 }
  0x12   :  { %v106_v0 = vadd.f32 %v105_v60, %v104_v53  ;;  %v62_v1 = vsel %vm61_vm3, %v58_v56, %v51_v54  ;;  %v613_v47 = vpack.c.bf16 %v403_v46, %v402_v45  ;;  %v506_v54 = vld [vmem:[%s843_s6] ss:$0 sm:$0xff]  ;;  %p622_p0 = scmp.ne.s32.totalorder %s494_s19, %s621_s5  ;;  %p627_p2 = scmp.lt.s32.totalorder %s621_s5, %s621_s5 }
  0x13   :  { %v86_v63 = vsel %vm61_vm3, %v83_v59, %v76_v58  ;;  %v64_v5 = vadd.f32 %v62_v1, %v41_v61  ;;  %v507_v58 = vld [vmem:[%s845_s8] ss:$0 sm:$0xff] }
  0x14   :  { %v88_v4 = vadd.f32 %v86_v63, %v67_v57  ;;  %v109_v6 = vsel %vm61_vm3, %v106_v0, %v99_v62  ;;  %p628_p3 = por %p627_p2, %p626_p1 }
  0x15   :  { %66 = vst.msk [vmem:[#allocation2] sm:$0x3] %vm37_vm0, %v64_v5  ;;  %v111_v7 = vadd.f32 %v109_v6, %v90_v2 }
  0x16   :  { %89 = vst.msk [vmem:[#allocation3] sm:$0x3] %vm37_vm0, %v88_v4  ;;  %p629_p4 = pnand %p628_p3, %p622_p0 }
  0x17   :  { %112 = vst.msk [vmem:[#allocation4] sm:$0x3] %vm37_vm0, %v111_v7 }
  0x1c   :  { %v116_v12 = vld [vmem:[#allocation2] sm:$0x3] }
  0x1d   :  { %v118_v11 = vld [vmem:[#allocation3] sm:$0x3]  ;;  %v117_v15 = vmul.f32 0.125, %v116_v12 }
  0x1e   :  { %v119_v14 = vmul.f32 0.125, %v118_v11  ;;  %v120_v19 = vld [vmem:[#allocation4] sm:$0x3] }
  0x1f   :  { %553 = vmatmul.mubr.msk.f32.vlgmr.msra.gmra.mrb[0].mxu1 %vm44_vm1, %v117_v15  ;;  %v121_v20 = vmul.f32 0.125, %v120_v19 }
  0x20   :  { %542 = vmatmul.mubr.msk.f32.vlgmr.msra.gmra.mrb[0].mxu0 %vm44_vm1, %v119_v14  ;;  %582 = vmatprep.mubr.msk.f32.mxu1 %vm647_vm2, %v646_v8 }
  0x21   :  { %599 = vmatpush3.bf16.msra.mxu0 %v598_v13  ;;  %563 = vmatprep.mubr.msk.f32.mxu0 %vm647_vm2, %v646_v8 }
  0x22   :  { %600 = vmatprep.subr.bf16.mxu0 %v645_v3  ;;  %605 = vmatpush3.bf16.msra.mxu1 %v604_v38 }
  0x23   :  { %606 = vmatprep.subr.bf16.mxu1 %v645_v3 }
  0x25   :  { %602 = vmatpush3.bf16.msra.mxu0 %v601_v18 }
  0x26   :  { %608 = vmatpush3.bf16.msra.mxu1 %v607_v41 }
  0x27   :  { %609 = vmatprep.subr.bf16.mxu1 %v645_v3 }
  0x28   :  { %564 = vmatmul.mubr.msk.f32.vlgmr.msra.gmra.mrb[2].mxu0 %vm44_vm1, %v121_v20 }
  0x2a   :  { %611 = vmatpush3.bf16.msra.mxu1 %v610_v44 }
  0x2b   :  { %612 = vmatprep.subr.bf16.mxu1 %v645_v3 }
  0x2e   :  { %614 = vmatpush3.bf16.msra.mxu1 %v613_v47 }
  0xf2   :  { %v272_v22 = vpop.f32.mrb[0].mxu1 }
  0xf3   :  { %v199_v21 = vpop.f32.mrb[0].mxu0  ;;  %v554_v25 = vpop.f32.mrb[1].mxu1 }
  0xf4   :  { %v273_v23 = vadd.f32 %v272_v22, %v199_v21  ;;  %v543_v24 = vpop.f32.mrb[1].mxu0 }
  0xfb   :  { %v349_v26 = vpop.f32.mrb[2].mxu0 }
  0xfc   :  { %v353_v28 = vadd.f32 %v349_v26, %v273_v23  ;;  %v565_v29 = vpop.f32.mrb[3].mxu0 }
  0xfe   :  { %v361_v30 = vadd.f32 %v504_v27, %v353_v28 }
 0x100   :  { %v363_v31 = vsel %vm362_vm4, %v361_v30, 0.0 }
 0x101   :  { %364 = vadd.xlane.f32.xlu0 %v363_v31 }
 0x18e   :  { %v365_v8 = vpop.xlane.xlu0 %364 }
 0x18f   :  { %v367_v32 = vmul.f32 0.015625, %v365_v8 }
 0x191   :  { %v368_v33 = vsub.f32 %v361_v30, %v367_v32 }
 0x193   :  { %v369_v34 = vmul.f32 %v368_v33, %v368_v33 }
 0x195   :  { %v370_v35 = vsel %vm362_vm4, %v369_v34, 0.0 }
 0x196   :  { %371 = vadd.xlane.f32.xlu0 %v370_v35 }
 0x223   :  { %v372_v48 = vpop.xlane.xlu0 %371 }
 0x224   :  { %v373_v49 = vmul.f32 0.015625, %v372_v48 }
 0x226   :  { %v374_v50 = vadd.f32 1e-05, %v373_v49 }
 0x228   :  { %619 = vrsqrt.f32 %v374_v50 }
 0x232   :  { %v620_v51 = vpop.eup %619 }
 0x233   :  { %v376_v53 = vmul.f32 %v620_v51, %v368_v33 }
 0x235   :  { %v384_v55 = vmul.f32 %v505_v52, %v376_v53 }
 0x237   :  { %v392_v56 = vadd.f32 %v506_v54, %v384_v55 }
 0x239   :  { %vm393_vm5 = vcmp.gt.f32.partialorder %v392_v56, 0.0  ;;  %v394_v57 = vmul.f32 0.01, %v392_v56 }
 0x23b   :  { %v395_v3 = vsel %vm393_vm5, %v392_v56, %v394_v57 }
 0x23c   :  { %583 = vmatmul.mubr.msk.f32.vlgmr.msra.gmra.mrb[2].mxu1 %vm411_vm6, %v395_v3 }
 0x30f   :  { %v481_v59 = vpop.f32.mrb[2].mxu1 }
 0x310   :  { %v482_v60 = vadd.f32 %v507_v58, %v481_v59  ;;  %v584_v61 = vpop.f32.mrb[3].mxu1 }
 0x312   :  { %486 = vst.msk [vmem:[#allocation5] sm:$0x3] %vm485_vm7, %v482_v60 }
 0x313   :  { %632 = shalt.err (!%p629_p4)
}
 0x314   :  { %s633_s3 = scalar_lea.hbm %s846_s9, 32 }
 0x315   :  { %p634_p5 = scmp.ne.s32.totalorder %s846_s9, %s633_s3  ;;  %p637_p6 = scmp.lt.u32.totalorder %s633_s3, %s846_s9 }
 0x317   :  { %p639_p7 = pnand %p637_p6, %p634_p5 }
 0x319   :  { %642 = shalt.err (!%p639_p7)
}
 0x31a   :  { %496 = dma.vmem_to_hbm [thread:$0]  %s494_s19, 32, %s846_s9, [#allocation6]  }
 0x31b   :  { %643 = dma.done.wait [#allocation6], 32  }
 0x31c   :  { %644 = vsyncadd [#allocation6], 4294967264 }
 0x31d   :  { %500 = vsyncpa [#allocation6], 1 }

</bundles_post_ra>
